<compile_context>
chip_gen: v7x
topology: tpu7x:2x2x1
jax: 0.10.0
libtpu: 0.0.40
codegen_flags: <defaults>
</compile_context>

<pallas_src>
import jax
import jax.numpy as jnp
from jax.experimental import pallas as pl
from jax.experimental.pallas import tpu as pltpu

D_IN, H1, H2, D_OUT = 512, 512, 10, 2
H2_PAD, D_OUT_PAD = 128, 128  # lane-dense padded widths


def mlp_kernel(x_ref, w1_ref, b1_ref, w2_ref, b2_ref, w3_ref, b3_ref, o_ref):
    # fc1 + ReLU: bf16 (or f32) MXU matmul with f32 accumulation; f32 epilogue.
    h1 = jnp.dot(x_ref[...], w1_ref[...], preferred_element_type=jnp.float32)
    h1 = jnp.maximum(h1 + b1_ref[...], 0.0)
    # fc2 + ReLU (padded to 128 lanes; padded columns are exactly 0 after ReLU).
    h2 = jnp.dot(h1.astype(w2_ref.dtype), w2_ref[...],
                 preferred_element_type=jnp.float32)
    h2 = jnp.maximum(h2 + b2_ref[...], 0.0)
    # fc3 (no activation); padded output columns stay exactly 0.
    o_ref[...] = (jnp.dot(h2.astype(w3_ref.dtype), w3_ref[...],
                          preferred_element_type=jnp.float32) + b3_ref[...])


def _pick_tile_b(B):
    """Tile-size heuristic per the perf review:
      * B <= 256: single grid step (weight-HBM-bound regime; tiny tiles only add the
        ~0.35us/step overhead and under-fill the 256-row MXU on v6e/v7x).
      * Larger B: biggest 256-aligned tile (up to 2048) giving >= 4 grid steps, so each
        v7x TensorCore gets >= 2 steps and the x DMA pipelines against compute.
      * Fallbacks keep >= 2 steps, then 16-aligned tiles, then grid=1."""
    if B <= 256:
        return B
    for t in (2048, 1024, 512, 256):
        if B % t == 0 and B // t >= 4:
            return t
    for t in (2048, 1024, 512, 256):
        if B % t == 0 and B // t >= 2:
            return t
    for t in (512, 256, 128, 64, 32, 16):
        if B % t == 0 and B // t >= 2:
            return t
    return B


def simple_nn_forward(x, w1, b1, w2, b2, w3, b3, *, tile_b=None, use_bf16=True):
    """x: [B, 512] f32.  w_i are [in, out] (transposed from PyTorch [out, in]),
    b_i are [1, out].  Returns [B, 2] f32."""
    B = x.shape[0]
    if tile_b is None:
        tile_b = _pick_tile_b(B)
    assert B % tile_b == 0, "batch must be divisible by tile_b"
    if tile_b != B:
        # sublane packing: 16 rows per vreg for bf16, 8 for f32
        assert tile_b % (16 if use_bf16 else 8) == 0
    grid = (B // tile_b,)

    cdt = jnp.bfloat16 if use_bf16 else jnp.float32
    # Cast x and weights in the wrapper (not in-kernel); biases stay f32.
    xc = x.astype(cdt)
    w1c = w1.astype(cdt)
    # Zero-pad the lane-sparse dims to 128 so every tile is lane-dense.
    w2p = jnp.zeros((H1, H2_PAD), cdt).at[:, :H2].set(w2.astype(cdt))
    b2p = jnp.zeros((1, H2_PAD), jnp.float32).at[:, :H2].set(b2)
    w3p = jnp.zeros((H2_PAD, D_OUT_PAD), cdt).at[:H2, :D_OUT].set(w3.astype(cdt))
    b3p = jnp.zeros((1, D_OUT_PAD), jnp.float32).at[:, :D_OUT].set(b3)

    def row_map(i):
        return (i, 0)

    def rep_map(i):
        return (0, 0)

    def rep_spec(shape):
        # Grid-invariant operand: constant block index -> single-buffered (saves VMEM).
        return pl.BlockSpec(shape, rep_map, pipeline_mode=pl.Buffered(1))

    itemsize = jnp.dtype(cdt).itemsize
    bytes_accessed = int(
        (xc.size + w1c.size + w2p.size + w3p.size) * itemsize
        + (b1.size + b2p.size + b3p.size) * 4
        + B * D_OUT_PAD * 4
    )
    flops = int(2 * B * (D_IN * H1 + H1 * H2_PAD + H2_PAD * D_OUT_PAD))

    out_padded = pl.pallas_call(
        mlp_kernel,
        out_shape=jax.ShapeDtypeStruct((B, D_OUT_PAD), jnp.float32),
        grid_spec=pltpu.PrefetchScalarGridSpec(
            num_scalar_prefetch=0,
            grid=grid,
            in_specs=[
                pl.BlockSpec((tile_b, D_IN), row_map),   # x tile (double-buffered)
                rep_spec((D_IN, H1)),                    # W1 (bf16 by default)
                rep_spec((1, H1)),                       # b1 (f32)
                rep_spec((H1, H2_PAD)),                  # W2 (padded, bf16)
                rep_spec((1, H2_PAD)),                   # b2 (padded, f32)
                rep_spec((H2_PAD, D_OUT_PAD)),           # W3 (padded, bf16)
                rep_spec((1, D_OUT_PAD)),                # b3 (padded, f32)
            ],
            out_specs=pl.BlockSpec((tile_b, D_OUT_PAD), row_map),
        ),
        compiler_params=pltpu.CompilerParams(
            dimension_semantics=("parallel",),
            vmem_limit_bytes=32 * 1024 * 1024,  # safe per-core headroom on v5e/v6e/v7x
        ),
        cost_estimate=pl.CostEstimate(
            flops=flops, transcendentals=0, bytes_accessed=bytes_accessed),
    )(xc, w1c, b1, w2p, b2p, w3p, b3p)

    # Slice the 2 real output columns back out (padded columns are exactly zero).
    return out_padded[:, :D_OUT]


def init_params(key):
    """Deterministic init mimicking nn.Linear default (uniform(-1/sqrt(in), 1/sqrt(in)))."""
    ks = jax.random.split(key, 6)

    def linear(kw, kb, fan_in, fan_out):
        bound = 1.0 / jnp.sqrt(fan_in)
        # stored as [in, out] (transpose of PyTorch's [out, in])
        w = jax.random.uniform(kw, (fan_in, fan_out), jnp.float32, -bound, bound)
        b = jax.random.uniform(kb, (1, fan_out), jnp.float32, -bound, bound)
        return w, b

    w1, b1 = linear(ks[0], ks[1], D_IN, H1)
    w2, b2 = linear(ks[2], ks[3], H1, H2)
    w3, b3 = linear(ks[4], ks[5], H2, D_OUT)
    return w1, b1, w2, b2, w3, b3


def reference_forward(x, w1, b1, w2, b2, w3, b3):
    h = jnp.maximum(x @ w1 + b1, 0.0)
    h = jnp.maximum(h @ w2 + b2, 0.0)
    return h @ w3 + b3


if __name__ == "__main__":
    key = jax.random.PRNGKey(0)
    k_x, k_p = jax.random.split(key)
    params = init_params(k_p)

    # Small batch -> single-step (grid=(1,)) path with the default bf16 compute.
    B_small = 32
    x_s = jax.random.normal(k_x, (B_small, D_IN), jnp.float32)
    ref_s = reference_forward(x_s, *params)

    out_bf16 = jax.block_until_ready(simple_nn_forward(x_s, *params))
    assert out_bf16.shape == (B_small, D_OUT)
    assert jnp.allclose(out_bf16, ref_s, atol=5e-2, rtol=5e-2), "bf16 path diverged"

    # Exact f32 path validates the padding / tiling structure at tight tolerance.
    out_f32 = jax.block_until_ready(simple_nn_forward(x_s, *params, use_bf16=False))
    assert jnp.allclose(out_f32, ref_s, atol=1e-4, rtol=1e-4), "f32 path mismatch"

    # Larger batch -> tiled path (tile_b=256, grid=(4,)) exercises the pipelined DMA
    # and the parallel batch axis.
    B_big = 1024
    x_b = jax.random.normal(k_x, (B_big, D_IN), jnp.float32)
    out_b = jax.block_until_ready(simple_nn_forward(x_b, *params))
    ref_b = reference_forward(x_b, *params)
    assert jnp.allclose(out_b, ref_b, atol=5e-2, rtol=5e-2), "tiled bf16 path diverged"

    print("KERNEL_OK")
</pallas_src>

<mosaic_0001>
module attributes {stable_mosaic.version = 11 : i64} {
  func.func @mlp_kernel(%arg0: i32, %arg1: memref<32x512xbf16, #tpu.memory_space<vmem>>, %arg2: memref<512x512xbf16, #tpu.memory_space<vmem>>, %arg3: memref<1x512xf32, #tpu.memory_space<vmem>>, %arg4: memref<512x128xbf16, #tpu.memory_space<vmem>>, %arg5: memref<1x128xf32, #tpu.memory_space<vmem>>, %arg6: memref<128x128xbf16, #tpu.memory_space<vmem>>, %arg7: memref<1x128xf32, #tpu.memory_space<vmem>>, %arg8: memref<32x128xf32, #tpu.memory_space<vmem>>) attributes {dimension_semantics = [#tpu.dimension_semantics<parallel>], iteration_bounds = array<i64: 1>, scalar_prefetch = 0 : i64, scratch_operands = 0 : i64, tpu.core_type = #tpu.core_type<tc>, window_params = [{transform_indices = @transform_0, window_bounds = array<i64: 32, 512>}, {pipeline_mode = #tpu.pipeline_mode<synchronous>, transform_indices = @transform_1, window_bounds = array<i64: 512, 512>}, {pipeline_mode = #tpu.pipeline_mode<synchronous>, transform_indices = @transform_2, window_bounds = array<i64: 1, 512>}, {pipeline_mode = #tpu.pipeline_mode<synchronous>, transform_indices = @transform_3, window_bounds = array<i64: 512, 128>}, {pipeline_mode = #tpu.pipeline_mode<synchronous>, transform_indices = @transform_4, window_bounds = array<i64: 1, 128>}, {pipeline_mode = #tpu.pipeline_mode<synchronous>, transform_indices = @transform_5, window_bounds = array<i64: 128, 128>}, {pipeline_mode = #tpu.pipeline_mode<synchronous>, transform_indices = @transform_6, window_bounds = array<i64: 1, 128>}, {transform_indices = @transform_7, window_bounds = array<i64: 32, 128>}]} {
    %c0 = arith.constant 0 : index
    %c0_0 = arith.constant 0 : index
    %0 = vector.load %arg1[%c0, %c0_0] : memref<32x512xbf16, #tpu.memory_space<vmem>>, vector<32x512xbf16>
    %c0_1 = arith.constant 0 : index
    %c0_2 = arith.constant 0 : index
    %1 = vector.load %arg2[%c0_1, %c0_2] : memref<512x512xbf16, #tpu.memory_space<vmem>>, vector<512x512xbf16>
    %cst = arith.constant dense<0.000000e+00> : vector<32x512xf32>
    %2 = tpu.matmul %0, %1, %cst {dimension_numbers = #tpu.dot_dimension_numbers<[1], [0], [0], [1], [0, 0, 1, 1], [], []>} : vector<32x512xbf16>, vector<512x512xbf16>, vector<32x512xf32> -> vector<32x512xf32>
    %c0_3 = arith.constant 0 : index
    %c0_4 = arith.constant 0 : index
    %3 = vector.load %arg3[%c0_3, %c0_4] : memref<1x512xf32, #tpu.memory_space<vmem>>, vector<1x512xf32>
    %4 = vector.broadcast %3 : vector<1x512xf32> to vector<32x512xf32>
    %5 = arith.addf %2, %4 : vector<32x512xf32>
    %cst_5 = arith.constant 0.000000e+00 : f32
    %6 = vector.broadcast %cst_5 : f32 to vector<32x512xf32>
    %7 = arith.maximumf %5, %6 : vector<32x512xf32>
    %8 = arith.truncf %7 : vector<32x512xf32> to vector<32x512xbf16>
    %c0_6 = arith.constant 0 : index
    %c0_7 = arith.constant 0 : index
    %9 = vector.load %arg4[%c0_6, %c0_7] : memref<512x128xbf16, #tpu.memory_space<vmem>>, vector<512x128xbf16>
    %cst_8 = arith.constant dense<0.000000e+00> : vector<32x128xf32>
    %10 = tpu.matmul %8, %9, %cst_8 {dimension_numbers = #tpu.dot_dimension_numbers<[1], [0], [0], [1], [0, 0, 1, 1], [], []>} : vector<32x512xbf16>, vector<512x128xbf16>, vector<32x128xf32> -> vector<32x128xf32>
    %c0_9 = arith.constant 0 : index
    %c0_10 = arith.constant 0 : index
    %11 = vector.load %arg5[%c0_9, %c0_10] : memref<1x128xf32, #tpu.memory_space<vmem>>, vector<1x128xf32>
    %12 = vector.broadcast %11 : vector<1x128xf32> to vector<32x128xf32>
    %13 = arith.addf %10, %12 : vector<32x128xf32>
    %cst_11 = arith.constant 0.000000e+00 : f32
    %14 = vector.broadcast %cst_11 : f32 to vector<32x128xf32>
    %15 = arith.maximumf %13, %14 : vector<32x128xf32>
    %16 = arith.truncf %15 : vector<32x128xf32> to vector<32x128xbf16>
    %c0_12 = arith.constant 0 : index
    %c0_13 = arith.constant 0 : index
    %17 = vector.load %arg6[%c0_12, %c0_13] : memref<128x128xbf16, #tpu.memory_space<vmem>>, vector<128x128xbf16>
    %cst_14 = arith.constant dense<0.000000e+00> : vector<32x128xf32>
    %18 = tpu.matmul %16, %17, %cst_14 {dimension_numbers = #tpu.dot_dimension_numbers<[1], [0], [0], [1], [0, 0, 1, 1], [], []>} : vector<32x128xbf16>, vector<128x128xbf16>, vector<32x128xf32> -> vector<32x128xf32>
    %c0_15 = arith.constant 0 : index
    %c0_16 = arith.constant 0 : index
    %19 = vector.load %arg7[%c0_15, %c0_16] : memref<1x128xf32, #tpu.memory_space<vmem>>, vector<1x128xf32>
    %20 = vector.broadcast %19 : vector<1x128xf32> to vector<32x128xf32>
    %21 = arith.addf %18, %20 : vector<32x128xf32>
    %c0_17 = arith.constant 0 : index
    %c0_18 = arith.constant 0 : index
    %22 = vector.load %arg8[%c0_17, %c0_18] : memref<32x128xf32, #tpu.memory_space<vmem>>, vector<32x128xf32>
    tpu.vector_store %arg8[%c0_17, %c0_18], %21 {strides = array<i32>} : memref<32x128xf32, #tpu.memory_space<vmem>>, vector<32x128xf32>,
    return
  }
  func.func @transform_0(%arg0: i32) -> (i32, i32) {
    %c0_i32 = arith.constant 0 : i32
    %c0_i32_0 = arith.constant 0 : i32
    return %arg0, %c0_i32 : i32, i32
  }
  func.func @transform_1(%arg0: i32) -> (i32, i32) {
    %c0_i32 = arith.constant 0 : i32
    %c0_i32_0 = arith.constant 0 : i32
    %c0_i32_1 = arith.constant 0 : i32
    return %c0_i32, %c0_i32_0 : i32, i32
  }
  func.func @transform_2(%arg0: i32) -> (i32, i32) {
    %c0_i32 = arith.constant 0 : i32
    %c0_i32_0 = arith.constant 0 : i32
    %c0_i32_1 = arith.constant 0 : i32
    return %c0_i32, %c0_i32_0 : i32, i32
  }
  func.func @transform_3(%arg0: i32) -> (i32, i32) {
    %c0_i32 = arith.constant 0 : i32
    %c0_i32_0 = arith.constant 0 : i32
    %c0_i32_1 = arith.constant 0 : i32
    return %c0_i32, %c0_i32_0 : i32, i32
  }
  func.func @transform_4(%arg0: i32) -> (i32, i32) {
    %c0_i32 = arith.constant 0 : i32
    %c0_i32_0 = arith.constant 0 : i32
    %c0_i32_1 = arith.constant 0 : i32
    return %c0_i32, %c0_i32_0 : i32, i32
  }
  func.func @transform_5(%arg0: i32) -> (i32, i32) {
    %c0_i32 = arith.constant 0 : i32
    %c0_i32_0 = arith.constant 0 : i32
    %c0_i32_1 = arith.constant 0 : i32
    return %c0_i32, %c0_i32_0 : i32, i32
  }
  func.func @transform_6(%arg0: i32) -> (i32, i32) {
    %c0_i32 = arith.constant 0 : i32
    %c0_i32_0 = arith.constant 0 : i32
    %c0_i32_1 = arith.constant 0 : i32
    return %c0_i32, %c0_i32_0 : i32, i32
  }
  func.func @transform_7(%arg0: i32) -> (i32, i32) {
    %c0_i32 = arith.constant 0 : i32
    %c0_i32_0 = arith.constant 0 : i32
    return %arg0, %c0_i32 : i32, i32
  }
}

</mosaic_0001>

<bundles_post_ra>
// kernel: tpu_custom_call.1
= control target key start
LH: loop header
LB: loop body
LE: loop exit
PB: predicated region body
PF: predicated region fallthrough
CT: control target
= control target key end

     0   :  { %12 = vsyncpa [#allocation3], 0  ;;  %s2463_s0 = inlined_call_operand.hbm [shape: bf16[32,512], index: 0, kind: input, shape index: {}]   ;;  %s2464_s1 = inlined_call_operand.hbm [shape: bf16[512,512], index: 1, kind: input, shape index: {}]   ;;  %s2465_s2 = inlined_call_operand.vmem [shape: f32[1,512], index: 2, kind: input, shape index: {}]   ;;  %s2466_s3 = inlined_call_operand.hbm [shape: bf16[512,128], index: 3, kind: input, shape index: {}]   ;;  %s2467_s4 = inlined_call_operand.vmem [shape: f32[1,128], index: 4, kind: input, shape index: {}]   ;;  %s2468_s5 = inlined_call_operand.hbm [shape: bf16[128,128], index: 5, kind: input, shape index: {}]   ;;  %s2469_s6 = inlined_call_operand.vmem [shape: f32[1,128], index: 6, kind: input, shape index: {}]   ;;  %s2470_s7 = inlined_call_operand.hbm [shape: f32[32,128], index: 7, kind: output, shape index: {}]  }
   0x1   :  { %13 = vsyncpa [#allocation6], 0 }
   0x2   :  { %14 = vsyncpa [#allocation9], 0 }
   0x3   :  { %15 = vsyncpa [#allocation4], 0  ;;  %s2336_s24 = smov [#allocation5]   ;;  %s2337_s26 = smov [#allocation2]  }
   0x4   :  { %s33_s25 = sshll.u32 %s2336_s24, 4  ;;  %s21_s27 = sshll.u32 %s2337_s26, 4  ;;  %s34_s25 = int_to_ptr.vmem [resolvable:$true] %s33_s25  ;;  %s2387_s27 = int_to_ptr.vmem [resolvable:$true] %s21_s27 }
   0x5   :  { %s2218_s30 = scalar_lea.hbm %s2464_s1, 16384 }
   0x6   :  { %p2219_p0 = scmp.ne.s32.totalorder %s2464_s1, %s2218_s30  ;;  %p2222_p1 = scmp.lt.u32.totalorder %s2218_s30, %s2464_s1 }
   0x8   :  { %p2224_p2 = pnand %p2222_p1, %p2219_p0 }
   0xa   :  { %2227 = shalt.err (!%p2224_p2)
}
   0xb   :  { %s2228_s12 = scalar_lea.vmem %s34_s25, 16384  ;;  %p2233_p4 = scmp.lt.s32.totalorder %s34_s25, %s34_s25 }
   0xc   :  { %p2229_p3 = scmp.ne.s32.totalorder %s34_s25, %s2228_s12  ;;  %p2234_p5 = scmp.lt.s32.totalorder %s2228_s12, %s2228_s12 }
   0xe   :  { %p2235_p6 = por %p2234_p5, %p2233_p4 }
  0x10   :  { %p2236_p7 = pnand %p2235_p6, %p2229_p3 }
  0x12   :  { %2239 = shalt.err (!%p2236_p7)
}
  0x13   :  { %s2338_s13 = smov 256   ;;  %s2339_s14 = smov 16  }
  0x14   :  { %39 = dma.hbm_to_vmem [thread:$0]  %s2464_s1, 16384, %s34_s25, [#allocation6], %s2338_s13, %s2338_s13, %s2339_s14  }
  0x15   :  { %s2240_s19 = scalar_lea.hbm %s2463_s0, 1024 }
  0x16   :  { %p2241_p8 = scmp.ne.s32.totalorder %s2463_s0, %s2240_s19  ;;  %p2244_p9 = scmp.lt.u32.totalorder %s2240_s19, %s2463_s0 }
  0x18   :  { %p2246_p10 = pnand %p2244_p9, %p2241_p8 }
  0x1a   :  { %2249 = shalt.err (!%p2246_p10)
}
  0x1b   :  { %s2250_s24 = scalar_lea.vmem %s2387_s27, 1024  ;;  %p2255_p12 = scmp.lt.s32.totalorder %s2387_s27, %s2387_s27 }
  0x1c   :  { %p2251_p11 = scmp.ne.s32.totalorder %s2387_s27, %s2250_s24  ;;  %p2256_p13 = scmp.lt.s32.totalorder %s2250_s24, %s2250_s24 }
  0x1e   :  { %p2257_p0 = por %p2256_p13, %p2255_p12 }
  0x20   :  { %p2258_p1 = pnand %p2257_p0, %p2251_p11 }
  0x22   :  { %2261 = shalt.err (!%p2258_p1)
}
  0x23   :  { %27 = dma.hbm_to_vmem [thread:$0]  %s2463_s0, 1024, %s2387_s27, [#allocation3], %s2338_s13, %s2338_s13, %s2339_s14  }
  0x24   :  { %s2340_s26 = smov [#allocation7]   ;;  %s2262_s8 = scalar_lea.hbm %s2466_s3, 4096 }
  0x25   :  { %s47_s28 = sshll.u32 %s2340_s26, 4  ;;  %p2263_p2 = scmp.ne.s32.totalorder %s2466_s3, %s2262_s8  ;;  %s48_s28 = int_to_ptr.vmem [resolvable:$true] %s47_s28 }
  0x26   :  { %p2266_p3 = scmp.lt.u32.totalorder %s2262_s8, %s2466_s3 }
  0x28   :  { %p2268_p4 = pnand %p2266_p3, %p2263_p2 }
  0x2a   :  { %2271 = shalt.err (!%p2268_p4)
}
  0x2b   :  { %s2272_s15 = scalar_lea.vmem %s48_s28, 4096  ;;  %p2277_p6 = scmp.lt.s32.totalorder %s48_s28, %s48_s28 }
  0x2c   :  { %p2273_p5 = scmp.ne.s32.totalorder %s48_s28, %s2272_s15  ;;  %p2278_p7 = scmp.lt.s32.totalorder %s2272_s15, %s2272_s15 }
  0x2e   :  { %p2279_p8 = por %p2278_p7, %p2277_p6 }
  0x30   :  { %p2280_p9 = pnand %p2279_p8, %p2273_p5 }
  0x32   :  { %2283 = shalt.err (!%p2280_p9)
}
  0x33   :  { %s2341_s0 = smov 64   ;;  %s2342_s27 = smov 4  }
  0x34   :  { %53 = dma.hbm_to_vmem [thread:$0]  %s2466_s3, 4096, %s48_s28, [#allocation6], %s2341_s0, %s2341_s0, %s2342_s27  }
  0x35   :  { %s2343_s16 = smov [#allocation8]   ;;  %s2284_s20 = scalar_lea.hbm %s2468_s5, 1024 }
  0x36   :  { %s61_s17 = sshll.u32 %s2343_s16, 4  ;;  %p2285_p10 = scmp.ne.s32.totalorder %s2468_s5, %s2284_s20  ;;  %s62_s17 = int_to_ptr.vmem [resolvable:$true] %s61_s17 }
  0x37   :  { %p2288_p11 = scmp.lt.u32.totalorder %s2284_s20, %s2468_s5 }
  0x39   :  { %p2290_p12 = pnand %p2288_p11, %p2285_p10 }
  0x3b   :  { %2293 = shalt.err (!%p2290_p12)
}
  0x3c   :  { %s2294_s1 = scalar_lea.vmem %s62_s17, 1024  ;;  %p2299_p0 = scmp.lt.s32.totalorder %s62_s17, %s62_s17 }
  0x3d   :  { %p2295_p13 = scmp.ne.s32.totalorder %s62_s17, %s2294_s1  ;;  %p2300_p1 = scmp.lt.s32.totalorder %s2294_s1, %s2294_s1 }
  0x3f   :  { %p2301_p2 = por %p2300_p1, %p2299_p0 }
  0x41   :  { %p2302_p3 = pnand %p2301_p2, %p2295_p13 }
  0x43   :  { %2305 = shalt.err (!%p2302_p3)
}
  0x44   :  { %67 = dma.hbm_to_vmem [thread:$0]  %s2468_s5, 1024, %s62_s17, [#allocation9], %s2341_s0, %s2341_s0, %s2342_s27  }
  0x45   :  { %2328 = dma.done.wait [#allocation3], 1024  }
  0x46   :  { %2329 = vsyncadd [#allocation3], 4294966272 }
  0x47   :  { %2330 = dma.done.wait [#allocation6], 20480  }
  0x48   :  { %2331 = vsyncadd [#allocation6], 4294946816 }
  0x49   :  { %2332 = dma.done.wait [#allocation9], 1024  }
  0x4a   :  { %2333 = vsyncadd [#allocation9], 4294966272  ;;  %v1974_v0 = vld [vmem:[#allocation5 + $0x4] ss:$16 sps:$4 sm:$0xff]   ;;  %v1976_v1 = vld [vmem:[#allocation5 + $0xc] ss:$16 sps:$4 sm:$0xff]  }
  0x4b   :  { %921 = vmatprep.subr.bf16.mxu0 %v1974_v0  ;;  %v1978_v2 = vld [vmem:[#allocation5] ss:$16 sps:$4 sm:$0xff]   ;;  %v1979_v3 = vld [vmem:[#allocation5 + $0x8] ss:$16 sps:$4 sm:$0xff]   ;;  %1027 = vmatprep.subr.bf16.mxu1 %v1976_v1  ;;  %v1980_v4 = vld [vmem:[#allocation5 + $0x24] ss:$16 sps:$4 sm:$0xff]  }
  0x4c   :  { %922 = vmatpush1.bf16.msra.mxu0 %v1978_v2  ;;  %1028 = vmatpush1.bf16.msra.mxu1 %v1979_v3  ;;  %v1982_v5 = vld [vmem:[#allocation5 + $0x2c] ss:$16 sps:$4 sm:$0xff]   ;;  %v1984_v6 = vld [vmem:[#allocation5 + $0x20] ss:$16 sps:$4 sm:$0xff]   ;;  %v1985_v7 = vld [vmem:[#allocation5 + $0x28] ss:$16 sps:$4 sm:$0xff]  }
  0x4d   :  { %923 = vmatprep.subr.bf16.mxu0 %v1980_v4  ;;  %1029 = vmatprep.subr.bf16.mxu1 %v1982_v5  ;;  %v1986_v8 = vld [vmem:[#allocation5 + $0x44] ss:$16 sps:$4 sm:$0xff]   ;;  %v1988_v9 = vld [vmem:[#allocation5 + $0x4c] ss:$16 sps:$4 sm:$0xff]   ;;  %v1990_v10 = vld [vmem:[#allocation5 + $0x40] ss:$16 sps:$4 sm:$0xff]  }
  0x4e   :  { %v1991_v11 = vld [vmem:[#allocation5 + $0x48] ss:$16 sps:$4 sm:$0xff]   ;;  %v1992_v12 = vld [vmem:[#allocation5 + $0x64] ss:$16 sps:$4 sm:$0xff]   ;;  %v1994_v13 = vld [vmem:[#allocation5 + $0x6c] ss:$16 sps:$4 sm:$0xff]  }
  0x4f   :  { %v1996_v14 = vld [vmem:[#allocation5 + $0x60] ss:$16 sps:$4 sm:$0xff]   ;;  %v1997_v15 = vld [vmem:[#allocation5 + $0x68] ss:$16 sps:$4 sm:$0xff]   ;;  %v1998_v16 = vld [vmem:[#allocation5 + $0x84] ss:$16 sps:$4 sm:$0xff]  }
  0x50   :  { %924 = vmatpush1.bf16.msra.mxu0 %v1984_v6  ;;  %1030 = vmatpush1.bf16.msra.mxu1 %v1985_v7  ;;  %v2000_v17 = vld [vmem:[#allocation5 + $0x8c] ss:$16 sps:$4 sm:$0xff]   ;;  %v2002_v18 = vld [vmem:[#allocation5 + $0x80] ss:$16 sps:$4 sm:$0xff]   ;;  %v2003_v19 = vld [vmem:[#allocation5 + $0x88] ss:$16 sps:$4 sm:$0xff]  }
  0x51   :  { %925 = vmatprep.subr.bf16.mxu0 %v1986_v8  ;;  %1031 = vmatprep.subr.bf16.mxu1 %v1988_v9  ;;  %v2004_v20 = vld [vmem:[#allocation5 + $0xa4] ss:$16 sps:$4 sm:$0xff]   ;;  %v2006_v21 = vld [vmem:[#allocation5 + $0xac] ss:$16 sps:$4 sm:$0xff]   ;;  %v2008_v22 = vld [vmem:[#allocation5 + $0xa0] ss:$16 sps:$4 sm:$0xff]  }
  0x52   :  { %v2009_v23 = vld [vmem:[#allocation5 + $0xa8] ss:$16 sps:$4 sm:$0xff]   ;;  %v2010_v24 = vld [vmem:[#allocation5 + $0xc4] ss:$16 sps:$4 sm:$0xff]   ;;  %v2012_v25 = vld [vmem:[#allocation5 + $0xcc] ss:$16 sps:$4 sm:$0xff]  }
  0x53   :  { %v2014_v26 = vld [vmem:[#allocation5 + $0xc0] ss:$16 sps:$4 sm:$0xff]   ;;  %v2015_v27 = vld [vmem:[#allocation5 + $0xc8] ss:$16 sps:$4 sm:$0xff]   ;;  %v2016_v28 = vld [vmem:[#allocation5 + $0xe4] ss:$16 sps:$4 sm:$0xff]  }
  0x54   :  { %926 = vmatpush1.bf16.msra.mxu0 %v1990_v10  ;;  %1032 = vmatpush1.bf16.msra.mxu1 %v1991_v11  ;;  %v2018_v29 = vld [vmem:[#allocation5 + $0xec] ss:$16 sps:$4 sm:$0xff]   ;;  %v2020_v30 = vld [vmem:[#allocation5 + $0xe0] ss:$16 sps:$4 sm:$0xff]   ;;  %v2021_v31 = vld [vmem:[#allocation5 + $0xe8] ss:$16 sps:$4 sm:$0xff]  }
  0x55   :  { %927 = vmatprep.subr.bf16.mxu0 %v1992_v12  ;;  %1033 = vmatprep.subr.bf16.mxu1 %v1994_v13  ;;  %v2022_v32 = vld [vmem:[#allocation5 + $0x104] ss:$16 sps:$4 sm:$0xff]   ;;  %v2024_v33 = vld [vmem:[#allocation5 + $0x10c] ss:$16 sps:$4 sm:$0xff]   ;;  %v2026_v34 = vld [vmem:[#allocation5 + $0x100] ss:$16 sps:$4 sm:$0xff]  }
  0x56   :  { %v2027_v35 = vld [vmem:[#allocation5 + $0x108] ss:$16 sps:$4 sm:$0xff]   ;;  %v2028_v36 = vld [vmem:[#allocation5 + $0x124] ss:$16 sps:$4 sm:$0xff]   ;;  %v2030_v37 = vld [vmem:[#allocation5 + $0x12c] ss:$16 sps:$4 sm:$0xff]  }
  0x57   :  { %v2032_v38 = vld [vmem:[#allocation5 + $0x120] ss:$16 sps:$4 sm:$0xff]   ;;  %v2033_v39 = vld [vmem:[#allocation5 + $0x128] ss:$16 sps:$4 sm:$0xff]   ;;  %v2034_v40 = vld [vmem:[#allocation5 + $0x144] ss:$16 sps:$4 sm:$0xff]  }
  0x58   :  { %928 = vmatpush1.bf16.msra.mxu0 %v1996_v14  ;;  %1034 = vmatpush1.bf16.msra.mxu1 %v1997_v15  ;;  %v2036_v41 = vld [vmem:[#allocation5 + $0x14c] ss:$16 sps:$4 sm:$0xff]   ;;  %v2038_v42 = vld [vmem:[#allocation5 + $0x140] ss:$16 sps:$4 sm:$0xff]   ;;  %v2039_v43 = vld [vmem:[#allocation5 + $0x148] ss:$16 sps:$4 sm:$0xff]  }
  0x59   :  { %929 = vmatprep.subr.bf16.mxu0 %v1998_v16  ;;  %1035 = vmatprep.subr.bf16.mxu1 %v2000_v17  ;;  %v2040_v44 = vld [vmem:[#allocation5 + $0x164] ss:$16 sps:$4 sm:$0xff]   ;;  %v2042_v45 = vld [vmem:[#allocation5 + $0x16c] ss:$16 sps:$4 sm:$0xff]   ;;  %v2044_v46 = vld [vmem:[#allocation5 + $0x160] ss:$16 sps:$4 sm:$0xff]  }
  0x5a   :  { %v2045_v47 = vld [vmem:[#allocation5 + $0x168] ss:$16 sps:$4 sm:$0xff]   ;;  %v2072_v48 = vld [vmem:[#allocation2 + $0x4] ss:$16 sps:$4 sm:$0xff]   ;;  %v2048_v50 = vld [vmem:[#allocation5 + $0x18c] ss:$16 sps:$4 sm:$0xff]  }
  0x5b   :  { %v2046_v49 = vld [vmem:[#allocation5 + $0x184] ss:$16 sps:$4 sm:$0xff]   ;;  %953 = vmatprep.mubr.bf16.mxu0 %v2072_v48  ;;  %1059 = vmatprep.mubr.bf16.mxu1 %v2072_v48  ;;  %v2050_v51 = vld [vmem:[#allocation5 + $0x180] ss:$16 sps:$4 sm:$0xff]   ;;  %v2051_v52 = vld [vmem:[#allocation5 + $0x188] ss:$16 sps:$4 sm:$0xff]  }
  0x5c   :  { %930 = vmatpush1.bf16.msra.mxu0 %v2002_v18  ;;  %1036 = vmatpush1.bf16.msra.mxu1 %v2003_v19  ;;  %v2052_v53 = vld [vmem:[#allocation5 + $0x1a4] ss:$16 sps:$4 sm:$0xff]   ;;  %v2054_v54 = vld [vmem:[#allocation5 + $0x1ac] ss:$16 sps:$4 sm:$0xff]   ;;  %v2056_v55 = vld [vmem:[#allocation5 + $0x1a0] ss:$16 sps:$4 sm:$0xff]  }
  0x5d   :  { %931 = vmatprep.subr.bf16.mxu0 %v2004_v20  ;;  %1037 = vmatprep.subr.bf16.mxu1 %v2006_v21  ;;  %v2057_v56 = vld [vmem:[#allocation5 + $0x1a8] ss:$16 sps:$4 sm:$0xff]   ;;  %v2058_v57 = vld [vmem:[#allocation5 + $0x1c4] ss:$16 sps:$4 sm:$0xff]   ;;  %v2060_v58 = vld [vmem:[#allocation5 + $0x1cc] ss:$16 sps:$4 sm:$0xff]  }
  0x5e   :  { %v2062_v59 = vld [vmem:[#allocation5 + $0x1c0] ss:$16 sps:$4 sm:$0xff]   ;;  %v2063_v60 = vld [vmem:[#allocation5 + $0x1c8] ss:$16 sps:$4 sm:$0xff]   ;;  %v2064_v61 = vld [vmem:[#allocation5 + $0x1e4] ss:$16 sps:$4 sm:$0xff]  }
  0x5f   :  { %v2066_v62 = vld [vmem:[#allocation5 + $0x1ec] ss:$16 sps:$4 sm:$0xff]   ;;  %v2068_v63 = vld [vmem:[#allocation5 + $0x1e0] ss:$16 sps:$4 sm:$0xff]   ;;  %v2069_v0 = vld [vmem:[#allocation5 + $0x1e8] ss:$16 sps:$4 sm:$0xff]  }
  0x60   :  { %932 = vmatpush1.bf16.msra.mxu0 %v2008_v22  ;;  %1038 = vmatpush1.bf16.msra.mxu1 %v2009_v23  ;;  %v2075_v1 = vld [vmem:[#allocation5 + $0x204] ss:$16 sps:$4 sm:$0xff]   ;;  %v2078_v2 = vld [vmem:[#allocation5 + $0x20c] ss:$16 sps:$4 sm:$0xff]   ;;  %v2070_v3 = vld [vmem:[#allocation2] ss:$16 sps:$4 sm:$0xff]  }
  0x61   :  { %933 = vmatprep.subr.bf16.mxu0 %v2010_v24  ;;  %1039 = vmatprep.subr.bf16.mxu1 %v2012_v25  ;;  %v2073_v4 = vld [vmem:[#allocation5 + $0x200] ss:$16 sps:$4 sm:$0xff]   ;;  %v2076_v5 = vld [vmem:[#allocation5 + $0x208] ss:$16 sps:$4 sm:$0xff]   ;;  %v2081_v6 = vld [vmem:[#allocation5 + $0x224] ss:$16 sps:$4 sm:$0xff]  }
  0x62   :  { %v2084_v7 = vld [vmem:[#allocation5 + $0x22c] ss:$16 sps:$4 sm:$0xff]   ;;  %v2079_v8 = vld [vmem:[#allocation5 + $0x220] ss:$16 sps:$4 sm:$0xff]   ;;  %v2082_v9 = vld [vmem:[#allocation5 + $0x228] ss:$16 sps:$4 sm:$0xff]  }
  0x63   :  { %v2087_v10 = vld [vmem:[#allocation5 + $0x244] ss:$16 sps:$4 sm:$0xff]   ;;  %v2090_v11 = vld [vmem:[#allocation5 + $0x24c] ss:$16 sps:$4 sm:$0xff]   ;;  %v2085_v12 = vld [vmem:[#allocation5 + $0x240] ss:$16 sps:$4 sm:$0xff]  }
  0x64   :  { %934 = vmatpush1.bf16.msra.mxu0 %v2014_v26  ;;  %1040 = vmatpush1.bf16.msra.mxu1 %v2015_v27  ;;  %v2088_v13 = vld [vmem:[#allocation5 + $0x248] ss:$16 sps:$4 sm:$0xff]   ;;  %v2093_v14 = vld [vmem:[#allocation5 + $0x264] ss:$16 sps:$4 sm:$0xff]   ;;  %v2096_v15 = vld [vmem:[#allocation5 + $0x26c] ss:$16 sps:$4 sm:$0xff]  }
  0x65   :  { %935 = vmatprep.subr.bf16.mxu0 %v2016_v28  ;;  %1041 = vmatprep.subr.bf16.mxu1 %v2018_v29  ;;  %v2091_v16 = vld [vmem:[#allocation5 + $0x260] ss:$16 sps:$4 sm:$0xff]   ;;  %v2094_v17 = vld [vmem:[#allocation5 + $0x268] ss:$16 sps:$4 sm:$0xff]   ;;  %v2099_v18 = vld [vmem:[#allocation5 + $0x284] ss:$16 sps:$4 sm:$0xff]  }
  0x66   :  { %v2102_v19 = vld [vmem:[#allocation5 + $0x28c] ss:$16 sps:$4 sm:$0xff]   ;;  %v2097_v20 = vld [vmem:[#allocation5 + $0x280] ss:$16 sps:$4 sm:$0xff]   ;;  %v2100_v21 = vld [vmem:[#allocation5 + $0x288] ss:$16 sps:$4 sm:$0xff]  }
  0x67   :  { %v2105_v22 = vld [vmem:[#allocation5 + $0x2a4] ss:$16 sps:$4 sm:$0xff]   ;;  %v2108_v23 = vld [vmem:[#allocation5 + $0x2ac] ss:$16 sps:$4 sm:$0xff]   ;;  %v2103_v24 = vld [vmem:[#allocation5 + $0x2a0] ss:$16 sps:$4 sm:$0xff]  }
  0x68   :  { %936 = vmatpush1.bf16.msra.mxu0 %v2020_v30  ;;  %1042 = vmatpush1.bf16.msra.mxu1 %v2021_v31  ;;  %v2157_v25 = vld [vmem:[#allocation2 + $0x24] ss:$16 sps:$4 sm:$0xff]   ;;  %v2106_v26 = vld [vmem:[#allocation5 + $0x2a8] ss:$16 sps:$4 sm:$0xff]   ;;  %v2159_v27 = vld [vmem:[#allocation2 + $0x20] ss:$16 sps:$4 sm:$0xff]  }
  0x69   :  { %937 = vmatprep.subr.bf16.mxu0 %v2022_v32  ;;  %1043 = vmatprep.subr.bf16.mxu1 %v2024_v33  ;;  %v2111_v28 = vld [vmem:[#allocation5 + $0x2c4] ss:$16 sps:$4 sm:$0xff]   ;;  %v2114_v29 = vld [vmem:[#allocation5 + $0x2cc] ss:$16 sps:$4 sm:$0xff]   ;;  %v2109_v30 = vld [vmem:[#allocation5 + $0x2c0] ss:$16 sps:$4 sm:$0xff]  }
  0x6a   :  { %v2112_v31 = vld [vmem:[#allocation5 + $0x2c8] ss:$16 sps:$4 sm:$0xff]   ;;  %v2117_v32 = vld [vmem:[#allocation5 + $0x2e4] ss:$16 sps:$4 sm:$0xff]   ;;  %v2120_v33 = vld [vmem:[#allocation5 + $0x2ec] ss:$16 sps:$4 sm:$0xff]  }
  0x6b   :  { %v2136_v48 = vld [vmem:[#allocation5 + $0x348] ss:$16 sps:$4 sm:$0xff]   ;;  %s2344_s30 = smov [#allocation10]  }
  0x6c   :  { %938 = vmatpush1.bf16.msra.mxu0 %v2026_v34  ;;  %1044 = vmatpush1.bf16.msra.mxu1 %v2027_v35  ;;  %v2174_v34 = vld [vmem:[#allocation2 + $0xc] ss:$16 sps:$4 sm:$0xff]   ;;  %v2115_v35 = vld [vmem:[#allocation5 + $0x2e0] ss:$16 sps:$4 sm:$0xff]   ;;  %s1653_s8 = sshll.u32 %s2344_s30, 4  ;;  %s1654_s8 = int_to_ptr.vmem [resolvable:$true] %s1653_s8 }
  0x6d   :  { %939 = vmatprep.subr.bf16.mxu0 %v2028_v36  ;;  %1045 = vmatprep.subr.bf16.mxu1 %v2030_v37  ;;  %v2118_v36 = vld [vmem:[#allocation5 + $0x2e8] ss:$16 sps:$4 sm:$0xff]   ;;  %v2123_v37 = vld [vmem:[#allocation5 + $0x304] ss:$16 sps:$4 sm:$0xff]   ;;  %s2306_s9 = scalar_lea.vmem %s1654_s8, 512  ;;  %p2311_p5 = scmp.lt.s32.totalorder %s1654_s8, %s1654_s8 }
  0x6e   :  { %p2307_p4 = scmp.ne.s32.totalorder %s1654_s8, %s2306_s9  ;;  %p2312_p6 = scmp.lt.s32.totalorder %s2306_s9, %s2306_s9 }
  0x70   :  { %940 = vmatpush1.bf16.msra.mxu0 %v2032_v38  ;;  %1046 = vmatpush1.bf16.msra.mxu1 %v2033_v39  ;;  %v2126_v38 = vld [vmem:[#allocation5 + $0x30c] ss:$16 sps:$4 sm:$0xff]   ;;  %v2121_v39 = vld [vmem:[#allocation5 + $0x300] ss:$16 sps:$4 sm:$0xff]   ;;  %p2313_p7 = por %p2312_p6, %p2311_p5 }
  0x71   :  { %941 = vmatprep.subr.bf16.mxu0 %v2034_v40  ;;  %1047 = vmatprep.subr.bf16.mxu1 %v2036_v41  ;;  %v2124_v40 = vld [vmem:[#allocation5 + $0x308] ss:$16 sps:$4 sm:$0xff]   ;;  %v2129_v41 = vld [vmem:[#allocation5 + $0x324] ss:$16 sps:$4 sm:$0xff]  }
  0x72   :  { %p2314_p8 = pnand %p2313_p7, %p2307_p4 }
  0x74   :  { %942 = vmatpush1.bf16.msra.mxu0 %v2038_v42  ;;  %1048 = vmatpush1.bf16.msra.mxu1 %v2039_v43  ;;  %v2132_v42 = vld [vmem:[#allocation5 + $0x32c] ss:$16 sps:$4 sm:$0xff]   ;;  %v2127_v43 = vld [vmem:[#allocation5 + $0x320] ss:$16 sps:$4 sm:$0xff]  }
  0x75   :  { %943 = vmatprep.subr.bf16.mxu0 %v2040_v44  ;;  %1049 = vmatprep.subr.bf16.mxu1 %v2042_v45  ;;  %v2130_v44 = vld [vmem:[#allocation5 + $0x328] ss:$16 sps:$4 sm:$0xff]   ;;  %v2135_v45 = vld [vmem:[#allocation5 + $0x344] ss:$16 sps:$4 sm:$0xff]  }
  0x78   :  { %944 = vmatpush1.bf16.msra.mxu0 %v2044_v46  ;;  %1050 = vmatpush1.bf16.msra.mxu1 %v2045_v47  ;;  %v2138_v46 = vld [vmem:[#allocation5 + $0x34c] ss:$16 sps:$4 sm:$0xff]   ;;  %v2133_v47 = vld [vmem:[#allocation5 + $0x340] ss:$16 sps:$4 sm:$0xff]  }
  0x79   :  { %945 = vmatprep.subr.bf16.mxu0 %v2046_v49  ;;  %1051 = vmatprep.subr.bf16.mxu1 %v2048_v50  ;;  %v2141_v49 = vld [vmem:[#allocation5 + $0x364] ss:$16 sps:$4 sm:$0xff]   ;;  %v2144_v50 = vld [vmem:[#allocation5 + $0x36c] ss:$16 sps:$4 sm:$0xff]  }
  0x7c   :  { %946 = vmatpush1.bf16.msra.mxu0 %v2050_v51  ;;  %1052 = vmatpush1.bf16.msra.mxu1 %v2051_v52  ;;  %v2139_v51 = vld [vmem:[#allocation5 + $0x360] ss:$16 sps:$4 sm:$0xff]   ;;  %v2142_v52 = vld [vmem:[#allocation5 + $0x368] ss:$16 sps:$4 sm:$0xff]  }
  0x7d   :  { %947 = vmatprep.subr.bf16.mxu0 %v2052_v53  ;;  %1053 = vmatprep.subr.bf16.mxu1 %v2054_v54  ;;  %v2147_v53 = vld [vmem:[#allocation5 + $0x384] ss:$16 sps:$4 sm:$0xff]   ;;  %v2150_v54 = vld [vmem:[#allocation5 + $0x38c] ss:$16 sps:$4 sm:$0xff]  }
  0x80   :  { %948 = vmatpush1.bf16.msra.mxu0 %v2056_v55  ;;  %1054 = vmatpush1.bf16.msra.mxu1 %v2057_v56  ;;  %v2145_v55 = vld [vmem:[#allocation5 + $0x380] ss:$16 sps:$4 sm:$0xff]   ;;  %v2148_v56 = vld [vmem:[#allocation5 + $0x388] ss:$16 sps:$4 sm:$0xff]  }
  0x81   :  { %949 = vmatprep.subr.bf16.mxu0 %v2058_v57  ;;  %1055 = vmatprep.subr.bf16.mxu1 %v2060_v58  ;;  %v2153_v57 = vld [vmem:[#allocation5 + $0x3a4] ss:$16 sps:$4 sm:$0xff]   ;;  %v2156_v58 = vld [vmem:[#allocation5 + $0x3ac] ss:$16 sps:$4 sm:$0xff]  }
  0x84   :  { %950 = vmatpush1.bf16.msra.mxu0 %v2062_v59  ;;  %1056 = vmatpush1.bf16.msra.mxu1 %v2063_v60  ;;  %v2151_v59 = vld [vmem:[#allocation5 + $0x3a0] ss:$16 sps:$4 sm:$0xff]   ;;  %v2154_v60 = vld [vmem:[#allocation5 + $0x3a8] ss:$16 sps:$4 sm:$0xff]  }
  0x85   :  { %951 = vmatprep.subr.bf16.mxu0 %v2064_v61  ;;  %1057 = vmatprep.subr.bf16.mxu1 %v2066_v62  ;;  %v2162_v61 = vld [vmem:[#allocation5 + $0x3c4] ss:$16 sps:$4 sm:$0xff]   ;;  %v2165_v62 = vld [vmem:[#allocation5 + $0x3cc] ss:$16 sps:$4 sm:$0xff]  }
  0x88   :  { %952 = vmatpush1.bf16.msra.mxu0 %v2068_v63  ;;  %1058 = vmatpush1.bf16.msra.mxu1 %v2069_v0  ;;  %v2160_v63 = vld [vmem:[#allocation5 + $0x3c0] ss:$16 sps:$4 sm:$0xff]   ;;  %v2163_v0 = vld [vmem:[#allocation5 + $0x3c8] ss:$16 sps:$4 sm:$0xff]  }
  0x89   :  { %974 = vmatprep.subr.bf16.mxu0 %v2075_v1  ;;  %1080 = vmatprep.subr.bf16.mxu1 %v2078_v2  ;;  %v2168_v1 = vld [vmem:[#allocation5 + $0x3e4] ss:$16 sps:$4 sm:$0xff]   ;;  %v2171_v2 = vld [vmem:[#allocation5 + $0x3ec] ss:$16 sps:$4 sm:$0xff]  }
  0x8b   :  { %954 = vmatmul.mubr.bf16.vlgmr.msra.gmra.mrb[0].mxu0 %v2070_v3  ;;  %1060 = vmatmul.mubr.bf16.vlgmr.msra.gmra.mrb[0].mxu1 %v2070_v3  ;;  %v2166_v3 = vld [vmem:[#allocation5 + $0x3e0] ss:$16 sps:$4 sm:$0xff]  }
  0x8c   :  { %975 = vmatpush1.bf16.msra.mxu0 %v2073_v4  ;;  %1081 = vmatpush1.bf16.msra.mxu1 %v2076_v5  ;;  %v2169_v4 = vld [vmem:[#allocation5 + $0x3e8] ss:$16 sps:$4 sm:$0xff]   ;;  %v2178_v5 = vld [vmem:[#allocation7 + $0x40] sm:$0xff]  }
  0x8d   :  { %976 = vmatprep.subr.bf16.mxu0 %v2081_v6  ;;  %1082 = vmatprep.subr.bf16.mxu1 %v2084_v7  ;;  %v2179_v6 = vld [vmem:[#allocation7 + $0xc0] sm:$0xff]   ;;  %v2172_v7 = vld [vmem:[#allocation2 + $0x8] ss:$16 sps:$4 sm:$0xff]  }
  0x8e   :  { %963 = vmatprep.mubr.bf16.mxu0 %v2157_v25  ;;  %1069 = vmatprep.mubr.bf16.mxu1 %v2157_v25  ;;  %v2195_v25 = vld [vmem:[#allocation7 + $0xe0] sm:$0xff]  }
  0x90   :  { %977 = vmatpush1.bf16.msra.mxu0 %v2079_v8  ;;  %1083 = vmatpush1.bf16.msra.mxu1 %v2082_v9  ;;  %v2175_v8 = vld [vmem:[#allocation2 + $0x2c] ss:$16 sps:$4 sm:$0xff]   ;;  %v2180_v9 = vld [vmem:[#allocation7] sm:$0xff]  }
  0x91   :  { %978 = vmatprep.subr.bf16.mxu0 %v2087_v10  ;;  %1084 = vmatprep.subr.bf16.mxu1 %v2090_v11  ;;  %v2181_v10 = vld [vmem:[#allocation7 + $0x80] sm:$0xff]   ;;  %v2182_v11 = vld [vmem:[#allocation7 + $0x48] sm:$0xff]  }
  0x93   :  { %964 = vmatmul.mubr.bf16.gmra.mrb[4].mxu0 %v2159_v27  ;;  %1070 = vmatmul.mubr.bf16.gmra.mrb[4].mxu1 %v2159_v27  ;;  %v2197_v27 = vld [vmem:[#allocation7 + $0xa0] sm:$0xff]  }
  0x94   :  { %979 = vmatpush1.bf16.msra.mxu0 %v2085_v12  ;;  %1085 = vmatpush1.bf16.msra.mxu1 %v2088_v13  ;;  %v2183_v12 = vld [vmem:[#allocation7 + $0xc8] sm:$0xff]  }
  0x95   :  { %980 = vmatprep.subr.bf16.mxu0 %v2093_v14  ;;  %1086 = vmatprep.subr.bf16.mxu1 %v2096_v15  ;;  %v2184_v13 = vld [vmem:[#allocation7 + $0x8] sm:$0xff]   ;;  %v2186_v15 = vld [vmem:[#allocation7 + $0x50] sm:$0xff]  }
  0x96   :  { %1006 = vmatprep.mubr.bf16.mxu0 %v2174_v34  ;;  %1112 = vmatprep.mubr.bf16.mxu1 %v2174_v34  ;;  %v2185_v14 = vld [vmem:[#allocation7 + $0x88] sm:$0xff]   ;;  %v2204_v34 = vld [vmem:[#allocation7 + $0x30] sm:$0xff]  }
  0x98   :  { %981 = vmatpush1.bf16.msra.mxu0 %v2091_v16  ;;  %1087 = vmatpush1.bf16.msra.mxu1 %v2094_v17  ;;  %v2187_v16 = vld [vmem:[#allocation7 + $0xd0] sm:$0xff]   ;;  %v2177_v17 = vld [vmem:[#allocation2 + $0x28] ss:$16 sps:$4 sm:$0xff]  }
  0x99   :  { %982 = vmatprep.subr.bf16.mxu0 %v2099_v18  ;;  %1088 = vmatprep.subr.bf16.mxu1 %v2102_v19  ;;  %v2188_v18 = vld [vmem:[#allocation7 + $0x10] sm:$0xff]  }
  0x9a   :  { %v2189_v19 = vld [vmem:[#allocation7 + $0x90] sm:$0xff]  }
  0x9c   :  { %983 = vmatpush1.bf16.msra.mxu0 %v2097_v20  ;;  %1089 = vmatpush1.bf16.msra.mxu1 %v2100_v21  ;;  %v2190_v20 = vld [vmem:[#allocation7 + $0x58] sm:$0xff]  }
  0x9d   :  { %984 = vmatprep.subr.bf16.mxu0 %v2105_v22  ;;  %1090 = vmatprep.subr.bf16.mxu1 %v2108_v23  ;;  %v2191_v21 = vld [vmem:[#allocation7 + $0xd8] sm:$0xff]  }
  0x9e   :  { %v2192_v22 = vld [vmem:[#allocation7 + $0x18] sm:$0xff]  }
  0x9f   :  { %v2193_v23 = vld [vmem:[#allocation7 + $0x98] sm:$0xff]  }
  0xa0   :  { %985 = vmatpush1.bf16.msra.mxu0 %v2103_v24  ;;  %1091 = vmatpush1.bf16.msra.mxu1 %v2106_v26  ;;  %v2194_v24 = vld [vmem:[#allocation7 + $0x60] sm:$0xff]  }
  0xa1   :  { %986 = vmatprep.subr.bf16.mxu0 %v2111_v28  ;;  %1092 = vmatprep.subr.bf16.mxu1 %v2114_v29  ;;  %v2196_v26 = vld [vmem:[#allocation7 + $0x20] sm:$0xff]   ;;  %v2198_v28 = vld [vmem:[#allocation7 + $0x68] sm:$0xff]  }
  0xa2   :  { %v2199_v29 = vld [vmem:[#allocation7 + $0xe8] sm:$0xff]  }
  0xa4   :  { %987 = vmatpush1.bf16.msra.mxu0 %v2109_v30  ;;  %1093 = vmatpush1.bf16.msra.mxu1 %v2112_v31  ;;  %v2200_v30 = vld [vmem:[#allocation7 + $0x28] sm:$0xff]  }
  0xa5   :  { %988 = vmatprep.subr.bf16.mxu0 %v2117_v32  ;;  %1094 = vmatprep.subr.bf16.mxu1 %v2120_v33  ;;  %v2201_v31 = vld [vmem:[#allocation7 + $0xa8] sm:$0xff]   ;;  %v2202_v32 = vld [vmem:[#allocation7 + $0x70] sm:$0xff]  }
  0xa6   :  { %v2203_v33 = vld [vmem:[#allocation7 + $0xf0] sm:$0xff]  }
  0xa8   :  { %989 = vmatpush1.bf16.msra.mxu0 %v2115_v35  ;;  %1095 = vmatpush1.bf16.msra.mxu1 %v2118_v36  ;;  %v2205_v35 = vld [vmem:[#allocation7 + $0xb0] sm:$0xff]   ;;  %v2206_v36 = vld [vmem:[#allocation7 + $0x78] sm:$0xff]  }
  0xa9   :  { %990 = vmatprep.subr.bf16.mxu0 %v2123_v37  ;;  %1096 = vmatprep.subr.bf16.mxu1 %v2126_v38  ;;  %v2207_v37 = vld [vmem:[#allocation7 + $0xf8] sm:$0xff]  }
  0xaa   :  { %v2208_v38 = vld [vmem:[#allocation7 + $0x38] sm:$0xff]  }
  0xac   :  { %991 = vmatpush1.bf16.msra.mxu0 %v2121_v39  ;;  %1097 = vmatpush1.bf16.msra.mxu1 %v2124_v40  ;;  %v2209_v39 = vld [vmem:[#allocation7 + $0xb8] sm:$0xff]   ;;  %v2210_v40 = vld [vmem:[#allocation8] sm:$0xff]  }
  0xad   :  { %992 = vmatprep.subr.bf16.mxu0 %v2129_v41  ;;  %1098 = vmatprep.subr.bf16.mxu1 %v2132_v42  ;;  %v221_v41 = vlaneseq }
  0xaf   :  { %v222_v42 = vshrl.u32 %v221_v41, 7 }
  0xb0   :  { %993 = vmatpush1.bf16.msra.mxu0 %v2127_v43  ;;  %1099 = vmatpush1.bf16.msra.mxu1 %v2130_v44 }
  0xb1   :  { %994 = vmatprep.subr.bf16.mxu0 %v2135_v45  ;;  %1100 = vmatprep.subr.bf16.mxu1 %v2138_v46  ;;  %v223_v43 = vsub.s32 0, %v222_v42  ;;  %v231_v44 = vsub.s32 2, %v222_v42  ;;  %v219_v45 = vld [vmem:[%s2465_s2] sm:$0xf]  ;;  %v227_v46 = vsub.s32 1, %v222_v42 }
  0xb4   :  { %995 = vmatpush1.bf16.msra.mxu0 %v2133_v47  ;;  %1101 = vmatpush1.bf16.msra.mxu1 %v2136_v48  ;;  %v235_v47 = vsub.s32 3, %v222_v42  ;;  %v224_v48 = vrot.slane %v219_v45, %v223_v43 }
  0xb5   :  { %996 = vmatprep.subr.bf16.mxu0 %v2141_v49  ;;  %1102 = vmatprep.subr.bf16.mxu1 %v2144_v50  ;;  %v232_v49 = vrot.slane %v219_v45, %v231_v44  ;;  %v228_v50 = vrot.slane %v219_v45, %v227_v46 }
  0xb8   :  { %997 = vmatpush1.bf16.msra.mxu0 %v2139_v51  ;;  %1103 = vmatpush1.bf16.msra.mxu1 %v2142_v52  ;;  %v236_v51 = vrot.slane %v219_v45, %v235_v47  ;;  %v2214_v47 = vld [vmem:[#allocation8 + $0x20] sm:$0xff]  }
  0xb9   :  { %998 = vmatprep.subr.bf16.mxu0 %v2147_v53  ;;  %1104 = vmatprep.subr.bf16.mxu1 %v2150_v54 }
  0xbc   :  { %999 = vmatpush1.bf16.msra.mxu0 %v2145_v55  ;;  %1105 = vmatpush1.bf16.msra.mxu1 %v2148_v56 }
  0xbd   :  { %1000 = vmatprep.subr.bf16.mxu0 %v2153_v57  ;;  %1106 = vmatprep.subr.bf16.mxu1 %v2156_v58 }
  0xc0   :  { %1001 = vmatpush1.bf16.msra.mxu0 %v2151_v59  ;;  %1107 = vmatpush1.bf16.msra.mxu1 %v2154_v60 }
  0xc1   :  { %1002 = vmatprep.subr.bf16.mxu0 %v2162_v61  ;;  %1108 = vmatprep.subr.bf16.mxu1 %v2165_v62 }
  0xc4   :  { %1003 = vmatpush1.bf16.msra.mxu0 %v2160_v63  ;;  %1109 = vmatpush1.bf16.msra.mxu1 %v2163_v0 }
  0xc5   :  { %1004 = vmatprep.subr.bf16.mxu0 %v2168_v1  ;;  %1110 = vmatprep.subr.bf16.mxu1 %v2171_v2 }
  0xc8   :  { %1005 = vmatpush1.bf16.msra.mxu0 %v2166_v3  ;;  %1111 = vmatpush1.bf16.msra.mxu1 %v2169_v4 }
  0xc9   :  { %1845 = vmatprep.subr.bf16.mxu0 %v2178_v5  ;;  %1873 = vmatprep.subr.bf16.mxu1 %v2179_v6 }
  0xcb   :  { %1007 = vmatmul.mubr.bf16.vlgmr.msra.gmra.mrb[0].mxu0 %v2172_v7  ;;  %1113 = vmatmul.mubr.bf16.vlgmr.msra.gmra.mrb[0].mxu1 %v2172_v7 }
  0xcc   :  { %1016 = vmatprep.mubr.bf16.mxu0 %v2175_v8  ;;  %1122 = vmatprep.mubr.bf16.mxu1 %v2175_v8 }
  0xcd   :  { %1846 = vmatpush3.bf16.msra.mxu0 %v2180_v9  ;;  %1874 = vmatpush3.bf16.msra.mxu1 %v2181_v10 }
  0xce   :  { %1847 = vmatprep.subr.bf16.mxu0 %v2182_v11  ;;  %1875 = vmatprep.subr.bf16.mxu1 %v2183_v12 }
  0xd1   :  { %1848 = vmatpush3.bf16.msra.mxu0 %v2184_v13  ;;  %1876 = vmatpush3.bf16.msra.mxu1 %v2185_v14 }
  0xd2   :  { %1849 = vmatprep.subr.bf16.mxu0 %v2186_v15  ;;  %1877 = vmatprep.subr.bf16.mxu1 %v2187_v16 }
  0xd3   :  { %1017 = vmatmul.mubr.bf16.gmra.mrb[4].mxu0 %v2177_v17  ;;  %1123 = vmatmul.mubr.bf16.gmra.mrb[4].mxu1 %v2177_v17 }
  0xd5   :  { %1850 = vmatpush3.bf16.msra.mxu0 %v2188_v18  ;;  %1878 = vmatpush3.bf16.msra.mxu1 %v2189_v19 }
  0xd6   :  { %1851 = vmatprep.subr.bf16.mxu0 %v2190_v20  ;;  %1879 = vmatprep.subr.bf16.mxu1 %v2191_v21 }
  0xd9   :  { %1852 = vmatpush3.bf16.msra.mxu0 %v2192_v22  ;;  %1880 = vmatpush3.bf16.msra.mxu1 %v2193_v23  ;;  %v2211_v22 = vld [vmem:[#allocation8 + $0x8] sm:$0xff]  }
  0xda   :  { %1853 = vmatprep.subr.bf16.mxu0 %v2194_v24  ;;  %1881 = vmatprep.subr.bf16.mxu1 %v2195_v25 }
  0xdd   :  { %1854 = vmatpush3.bf16.msra.mxu0 %v2196_v26  ;;  %1882 = vmatpush3.bf16.msra.mxu1 %v2197_v27 }
  0xde   :  { %1855 = vmatprep.subr.bf16.mxu0 %v2198_v28  ;;  %1883 = vmatprep.subr.bf16.mxu1 %v2199_v29 }
  0xe1   :  { %1856 = vmatpush3.bf16.msra.mxu0 %v2200_v30  ;;  %1884 = vmatpush3.bf16.msra.mxu1 %v2201_v31 }
  0xe2   :  { %1857 = vmatprep.subr.bf16.mxu0 %v2202_v32  ;;  %1885 = vmatprep.subr.bf16.mxu1 %v2203_v33 }
  0xe5   :  { %1858 = vmatpush3.bf16.msra.mxu0 %v2204_v34  ;;  %1886 = vmatpush3.bf16.msra.mxu1 %v2205_v35 }
  0xe6   :  { %1859 = vmatprep.subr.bf16.mxu0 %v2206_v36  ;;  %1887 = vmatprep.subr.bf16.mxu1 %v2207_v37  ;;  %v2212_v37 = vld [vmem:[#allocation8 + $0x10] sm:$0xff]  }
  0xe9   :  { %1860 = vmatpush3.bf16.msra.mxu0 %v2208_v38  ;;  %1888 = vmatpush3.bf16.msra.mxu1 %v2209_v39 }
  0xea   :  { %1911 = vmatprep.subr.bf16.mxu0 %v2210_v40 }
 0x19e   :  { %v1008_v52 = vpop.f32.mrb[0].mxu0  ;;  %v1114_v53 = vpop.f32.mrb[0].mxu1 }
 0x19f   :  { %v1931_v54 = vadd.f32 %v1008_v52, %v224_v48  ;;  %v1939_v55 = vadd.f32 %v1114_v53, %v232_v49  ;;  %v1010_v56 = vpop.f32.mrb[1].mxu0  ;;  %v1116_v57 = vpop.f32.mrb[1].mxu1  ;;  %v1803_v53 = vld [vmem:[%s2467_s4] ss:$0 sm:$0xff] }
 0x1a0   :  { %v1932_v58 = vadd.f32 %v1010_v56, %v228_v50  ;;  %v1940_v59 = vadd.f32 %v1116_v57, %v236_v51  ;;  %v1012_v60 = vpop.f32.mrb[2].mxu0  ;;  %v1118_v61 = vpop.f32.mrb[2].mxu1 }
 0x1a1   :  { %v1933_v62 = vadd.f32 %v1012_v60, %v224_v48  ;;  %v1941_v63 = vadd.f32 %v1118_v61, %v232_v49  ;;  %v1014_v0 = vpop.f32.mrb[3].mxu0  ;;  %v1120_v1 = vpop.f32.mrb[3].mxu1  ;;  %v1133_v4 = vmax.f32 %v1931_v54, 0.0  ;;  %v1135_v5 = vmax.f32 %v1939_v55, 0.0 }
 0x1a2   :  { %v1934_v2 = vadd.f32 %v1014_v0, %v228_v50  ;;  %v1942_v3 = vadd.f32 %v1120_v1, %v236_v51  ;;  %v1134_v8 = vmax.f32 %v1932_v58, 0.0  ;;  %v1136_v9 = vmax.f32 %v1940_v59, 0.0 }
 0x1a3   :  { %v1137_v6 = vmax.f32 %v1933_v62, 0.0  ;;  %v1139_v7 = vmax.f32 %v1941_v63, 0.0 }
 0x1a4   :  { %v1138_v10 = vmax.f32 %v1934_v2, 0.0  ;;  %v1140_v11 = vmax.f32 %v1942_v3, 0.0 }
 0x1a5   :  { %v1149_v12 = vpack.c.bf16 %v1137_v6, %v1133_v4  ;;  %v1151_v13 = vpack.c.bf16 %v1139_v7, %v1135_v5 }
 0x1a6   :  { %v1150_v14 = vpack.c.bf16 %v1138_v10, %v1134_v8  ;;  %v1152_v15 = vpack.c.bf16 %v1140_v11, %v1136_v9  ;;  %v1018_v16 = vpop.f32.mrb[4].mxu0  ;;  %v1124_v17 = vpop.f32.mrb[4].mxu1 }
 0x1a7   :  { %v1935_v18 = vadd.f32 %v1018_v16, %v224_v48  ;;  %v1943_v19 = vadd.f32 %v1124_v17, %v232_v49  ;;  %v1020_v20 = vpop.f32.mrb[5].mxu0  ;;  %v1126_v21 = vpop.f32.mrb[5].mxu1 }
 0x1a8   :  { %v1936_v23 = vadd.f32 %v1020_v20, %v228_v50  ;;  %v1944_v24 = vadd.f32 %v1126_v21, %v236_v51  ;;  %v1022_v25 = vpop.f32.mrb[6].mxu0  ;;  %v1128_v26 = vpop.f32.mrb[6].mxu1  ;;  %1452 = vmatprep.mubr.bf16.mxu0 %v1150_v14  ;;  %1501 = vmatprep.mubr.bf16.mxu1 %v1152_v15 }
 0x1a9   :  { %v1937_v27 = vadd.f32 %v1022_v25, %v224_v48  ;;  %v1945_v28 = vadd.f32 %v1128_v26, %v232_v49  ;;  %v1024_v29 = vpop.f32.mrb[7].mxu0  ;;  %v1130_v30 = vpop.f32.mrb[7].mxu1  ;;  %1453 = vmatmul.mubr.bf16.vlgmr.msra.gmra.mrb[8].mxu0 %v1149_v12  ;;  %1502 = vmatmul.mubr.bf16.vlgmr.msra.gmra.mrb[8].mxu1 %v1151_v13  ;;  %v1141_v33 = vmax.f32 %v1935_v18, 0.0  ;;  %v1143_v34 = vmax.f32 %v1943_v19, 0.0  ;;  %v2215_v48 = vld [vmem:[#allocation8 + $0x28] sm:$0xff]   ;;  %v2216_v49 = vld [vmem:[#allocation8 + $0x30] sm:$0xff]  }
 0x1aa   :  { %v1938_v31 = vadd.f32 %v1024_v29, %v228_v50  ;;  %v1946_v32 = vadd.f32 %v1130_v30, %v236_v51  ;;  %1912 = vmatpush3.bf16.msra.mxu0 %v2210_v40  ;;  %v1142_v38 = vmax.f32 %v1936_v23, 0.0  ;;  %v1144_v39 = vmax.f32 %v1944_v24, 0.0  ;;  %v2213_v40 = vld [vmem:[#allocation8 + $0x18] sm:$0xff]   ;;  %v1836_v26 = vld [vmem:[%s2469_s6] ss:$0 sm:$0xff] }
 0x1ab   :  { %v1145_v35 = vmax.f32 %v1937_v27, 0.0  ;;  %v1147_v36 = vmax.f32 %v1945_v28, 0.0  ;;  %1913 = vmatprep.subr.bf16.mxu0 %v2211_v22  ;;  %v2217_v50 = vld [vmem:[#allocation8 + $0x38] sm:$0xff]  }
 0x1ac   :  { %v1146_v41 = vmax.f32 %v1938_v31, 0.0  ;;  %v1148_v42 = vmax.f32 %v1946_v32, 0.0 }
 0x1ad   :  { %v1153_v43 = vpack.c.bf16 %v1145_v35, %v1141_v33  ;;  %v1155_v44 = vpack.c.bf16 %v1147_v36, %v1143_v34 }
 0x1ae   :  { %v1154_v45 = vpack.c.bf16 %v1146_v41, %v1142_v38  ;;  %v1156_v46 = vpack.c.bf16 %v1148_v42, %v1144_v39  ;;  %1914 = vmatpush3.bf16.msra.mxu0 %v2211_v22 }
 0x1af   :  { %1915 = vmatprep.subr.bf16.mxu0 %v2212_v37 }
 0x1b0   :  { %1460 = vmatprep.mubr.bf16.mxu0 %v1154_v45  ;;  %1509 = vmatprep.mubr.bf16.mxu1 %v1156_v46 }
 0x1b1   :  { %1461 = vmatmul.mubr.bf16.gmra.mrb[12].mxu0 %v1153_v43  ;;  %1510 = vmatmul.mubr.bf16.gmra.mrb[12].mxu1 %v1155_v44 }
 0x1b2   :  { %1916 = vmatpush3.bf16.msra.mxu0 %v2212_v37 }
 0x1b3   :  { %1917 = vmatprep.subr.bf16.mxu0 %v2213_v40 }
 0x1b6   :  { %1918 = vmatpush3.bf16.msra.mxu0 %v2213_v40 }
 0x1b7   :  { %1919 = vmatprep.subr.bf16.mxu0 %v2214_v47 }
 0x1ba   :  { %1920 = vmatpush3.bf16.msra.mxu0 %v2214_v47 }
 0x1bb   :  { %1921 = vmatprep.subr.bf16.mxu0 %v2215_v48 }
 0x1be   :  { %1922 = vmatpush3.bf16.msra.mxu0 %v2215_v48 }
 0x1bf   :  { %1923 = vmatprep.subr.bf16.mxu0 %v2216_v49 }
 0x1c2   :  { %1924 = vmatpush3.bf16.msra.mxu0 %v2216_v49 }
 0x1c3   :  { %1925 = vmatprep.subr.bf16.mxu0 %v2217_v50 }
 0x1c6   :  { %1926 = vmatpush3.bf16.msra.mxu0 %v2217_v50 }
 0x27c   :  { %v1861_v51 = vpop.f32.mrb[8].mxu0  ;;  %v1889_v52 = vpop.f32.mrb[8].mxu1 }
 0x27d   :  { %v1862_v54 = vpop.f32.mrb[9].mxu0  ;;  %v1890_v55 = vpop.f32.mrb[9].mxu1 }
 0x27e   :  { %v1863_v56 = vadd.f32 %v1862_v54, %v1861_v51  ;;  %v1891_v57 = vadd.f32 %v1890_v55, %v1889_v52  ;;  %v1864_v58 = vpop.f32.mrb[10].mxu0  ;;  %v1892_v59 = vpop.f32.mrb[10].mxu1 }
 0x27f   :  { %v1865_v60 = vpop.f32.mrb[11].mxu0  ;;  %v1893_v61 = vpop.f32.mrb[11].mxu1 }
 0x280   :  { %v1455_v62 = vadd.f32 %v1863_v56, %v1803_v53  ;;  %v1866_v63 = vadd.f32 %v1865_v60, %v1864_v58  ;;  %v1894_v0 = vadd.f32 %v1893_v61, %v1892_v59 }
 0x282   :  { %v1504_v1 = vadd.f32 %v1891_v57, %v1455_v62  ;;  %v1458_v2 = vadd.f32 %v1866_v63, %v1803_v53 }
 0x284   :  { %v1507_v3 = vadd.f32 %v1894_v0, %v1458_v2  ;;  %v1867_v4 = vpop.f32.mrb[12].mxu0  ;;  %v1895_v5 = vpop.f32.mrb[12].mxu1  ;;  %v1518_v8 = vmax.f32 %v1504_v1, 0.0 }
 0x285   :  { %v1868_v6 = vpop.f32.mrb[13].mxu0  ;;  %v1896_v7 = vpop.f32.mrb[13].mxu1 }
 0x286   :  { %v1519_v9 = vmax.f32 %v1507_v3, 0.0  ;;  %v1869_v10 = vadd.f32 %v1868_v6, %v1867_v4  ;;  %v1897_v11 = vadd.f32 %v1896_v7, %v1895_v5  ;;  %v1870_v12 = vpop.f32.mrb[14].mxu0  ;;  %v1898_v13 = vpop.f32.mrb[14].mxu1 }
 0x287   :  { %v1871_v14 = vpop.f32.mrb[15].mxu0  ;;  %v1899_v15 = vpop.f32.mrb[15].mxu1 }
 0x288   :  { %v1463_v16 = vadd.f32 %v1869_v10, %v1803_v53  ;;  %v1872_v17 = vadd.f32 %v1871_v14, %v1870_v12  ;;  %v1900_v18 = vadd.f32 %v1899_v15, %v1898_v13  ;;  %v1522_v19 = vpack.c.bf16 %v1519_v9, %v1518_v8 }
 0x28a   :  { %v1512_v20 = vadd.f32 %v1897_v11, %v1463_v16  ;;  %v1466_v21 = vadd.f32 %v1872_v17, %v1803_v53  ;;  %1927 = vmatprep.mubr.bf16.mxu0 %v1522_v19 }
 0x28c   :  { %v1515_v22 = vadd.f32 %v1900_v18, %v1466_v21  ;;  %v1520_v23 = vmax.f32 %v1512_v20, 0.0 }
 0x28e   :  { %v1521_v24 = vmax.f32 %v1515_v22, 0.0 }
 0x290   :  { %v1523_v25 = vpack.c.bf16 %v1521_v24, %v1520_v23 }
 0x292   :  { %1928 = vmatmul.mubr.bf16.vlgmr.msra.gmra.mrb[16].mxu0 %v1523_v25 }
 0x365   :  { %v1929_v27 = vpop.f32.mrb[16].mxu0 }
 0x366   :  { %v1638_v28 = vadd.f32 %v1929_v27, %v1836_v26  ;;  %v1629_v29 = vpop.f32.mrb[17].mxu0 }
 0x367   :  { %v1630_v30 = vadd.f32 %v1836_v26, %v1629_v29  ;;  %v1930_v31 = vpop.f32.mrb[18].mxu0 }
 0x368   :  { %1646 = vst [vmem:[#allocation10 + $0x10] sm:$0xff] %v1638_v28  ;;  %v1641_v32 = vadd.f32 %v1930_v31, %v1836_v26  ;;  %v1632_v33 = vpop.f32.mrb[19].mxu0 }
 0x369   :  { %1644 = vst [vmem:[#allocation10] sm:$0xff] %v1630_v30  ;;  %v1633_v34 = vadd.f32 %v1836_v26, %v1632_v33 }
 0x36a   :  { %1647 = vst [vmem:[#allocation10 + $0x18] sm:$0xff] %v1641_v32 }
 0x36b   :  { %1645 = vst [vmem:[#allocation10 + $0x8] sm:$0xff] %v1633_v34 }
 0x36c   :  { %2317 = shalt.err (!%p2314_p8)
}
 0x36d   :  { %s2318_s11 = scalar_lea.hbm %s2470_s7, 512 }
 0x36e   :  { %p2319_p9 = scmp.ne.s32.totalorder %s2470_s7, %s2318_s11  ;;  %p2322_p10 = scmp.lt.u32.totalorder %s2318_s11, %s2470_s7 }
 0x370   :  { %p2324_p11 = pnand %p2322_p10, %p2319_p9 }
 0x372   :  { %2327 = shalt.err (!%p2324_p11)
}
 0x373   :  { %s2345_s13 = smov 128   ;;  %s2346_s14 = smov 8  }
 0x374   :  { %1659 = dma.vmem_to_hbm [thread:$0]  %s1654_s8, 512, %s2470_s7, [#allocation4], %s2345_s13, %s2345_s13, %s2346_s14  }
 0x375   :  { %2334 = dma.done.wait [#allocation4], 512  }
 0x376   :  { %2335 = vsyncadd [#allocation4], 4294966784 }
 0x377   :  { %1663 = vsyncpa [#allocation3], 1 }
 0x378   :  { %1664 = vsyncpa [#allocation6], 1 }
 0x379   :  { %1665 = vsyncpa [#allocation9], 1 }
 0x37a   :  { %1666 = vsyncpa [#allocation4], 1 }

</bundles_post_ra>
